<compile_context>
chip_gen: v7x
topology: tpu7x:2x2x1
jax: 0.10.0
libtpu: 0.0.40
codegen_flags: <defaults>
</compile_context>

<pallas_src>
import jax
import jax.numpy as jnp
import numpy as np
from jax.experimental import pallas as pl
from jax.experimental.pallas import tpu as pltpu

B = 2                        # batch
CIN, COUT, K = 1, 5, 5       # conv channels / kernel size
H, W = 28, 28                # MNIST spatial size (forced by Linear(5*14*14, 120))
HP, WP = H // 2, W // 2      # 14, 14 after 2x2 maxpool
S = HP * WP                  # 196 spatial positions after pooling
FEAT = COUT * S              # 980
HID, NCLS = 120, 10
BN_EPS = 1e-3

# padded kernel-side dims (clean MXU / lane-dense tiles)
CPAD = 8                     # conv out channels 5   -> 8   (sublanes)
KPAD = 32                    # conv taps        25   -> 32  (contraction)
SPAD = 256                   # pooled spatial   196  -> 256 (lanes)
HPAD = 128                   # hidden           120  -> 128
CLSPAD = 128                 # classes          10   -> 128 (lane-dense output)


# ---------------------------------------------------------------------------
# Single fused kernel: conv(one wide MXU dot) + BN + maxpool + ReLU
#                      + batched dense1 + batched dense2 + lane-dense softmax
# ---------------------------------------------------------------------------
def mnist_fused_kernel(p_ref, wc_ref, scale_ref, bias_ref,
                       w1_ref, b1_ref, w2_ref, b2_ref, out_ref):
    """
    p_ref    : (KPAD, 4*B*SPAD) bf16  phase-major im2col patches
               p[kh*5+kw, (phase*B + b)*256 + i*14+j] = xpad[b, 2i+ph+kh, 2j+pw+kw]
    wc_ref   : (CPAD, KPAD)     bf16  conv weights (rows/cols zero-padded)
    scale_ref: (CPAD, 1)        f32   gamma / sqrt(running_var + eps)  (folded BN)
    bias_ref : (CPAD, 1)        f32   beta - running_mean * scale
    w1_ref   : (COUT*SPAD, HPAD) bf16 W1, row = c*256+s, natural (K,N) layout
    b1_ref   : (1, HPAD)        f32
    w2_ref   : (HPAD, CLSPAD)   f32   W2^T, natural (K,N); padded class cols zero
    b2_ref   : (1, CLSPAD)      f32   padded class lanes = -1e30
    out_ref  : (B, CLSPAD)      f32   softmax probs (lane-dense; real classes 0..9)
    """
    nb = out_ref.shape[0]
    L = nb * SPAD                                         # lanes per pooling phase

    # ---- conv for every (phase, batch, spatial) in ONE MXU dot (bf16 -> f32)
    conv = jnp.dot(wc_ref[...], p_ref[...],
                   preferred_element_type=jnp.float32)    # (8, 4*L)
    bn = conv * scale_ref[...] + bias_ref[...]            # folded BatchNorm

    # ---- 2x2 maxpool = max over the 4 contiguous phase slices, then ReLU
    pooled = jnp.maximum(jnp.maximum(bn[:, 0:L],       bn[:, L:2 * L]),
                         jnp.maximum(bn[:, 2 * L:3 * L], bn[:, 3 * L:4 * L]))
    act = jnp.maximum(pooled, 0.0)                        # (8, B*256), ch on sublanes

    # ---- flatten (channel, spatial) onto lanes per sample (layout plumbing
    #      only; B=2 static loop — all math below is batched over B)
    rows = []
    for b in range(nb):
        ab = act[:, b * SPAD:(b + 1) * SPAD]              # (8, 256)
        rows.append(jnp.concatenate([ab[c:c + 1, :] for c in range(COUT)],
                                    axis=1))              # (1, 1280), col = c*256+s
    flat = jnp.concatenate(rows, axis=0)                  # (B, 1280)

    # ---- dense1: ONE (B,1280)x(1280,128) MXU dot, no weight transpose
    h = jnp.dot(flat.astype(jnp.bfloat16), w1_ref[...],
                preferred_element_type=jnp.float32) + b1_ref[...]
    h = jnp.maximum(h, 0.0)                               # (B, 128)

    # ---- dense2 + lane-dense softmax over 128 padded class lanes
    #      (padded lanes carry bias -1e30 -> exp == 0, so the normalization
    #       only sees the 10 real classes)
    logits = jnp.dot(h, w2_ref[...],
                     preferred_element_type=jnp.float32) + b2_ref[...]   # (B, 128)
    m = jnp.max(logits, axis=1, keepdims=True)
    e = jnp.exp(logits - m)
    denom = jnp.sum(e, axis=1, keepdims=True)
    out_ref[...] = e * pl.reciprocal(denom)               # exact reciprocal


# ---------------------------------------------------------------------------
# One-time parameter re-layout (pre-transpose/pad weights; fold eval-mode BN;
# cast the large operands to bf16 to halve the per-call HBM->VMEM DMA)
# ---------------------------------------------------------------------------
def prepare_params(params):
    conv_w, gamma, beta, run_mean, run_var, w1, b1, w2, b2 = params

    # eval-mode BatchNorm folded into a per-channel affine
    # TODO(synk): training-mode BatchNorm (batch statistics + running-stat
    # updates) is not implemented; forward uses running stats (model.eval()).
    bn_scale = gamma / jnp.sqrt(run_var + BN_EPS)
    bn_bias = beta - run_mean * bn_scale

    wc = jnp.zeros((CPAD, KPAD), jnp.float32).at[:COUT, :K * K].set(
        conv_w.reshape(COUT, K * K).astype(jnp.float32)).astype(jnp.bfloat16)
    scale8 = jnp.zeros((CPAD, 1), jnp.float32).at[:COUT, 0].set(bn_scale)
    bias8 = jnp.zeros((CPAD, 1), jnp.float32).at[:COUT, 0].set(bn_bias)

    # W1 (120, 980) -> (COUT*SPAD=1280, HPAD=128) bf16, contraction on dim 0.
    # Row index = c*256 + s; spatial rows 196..255 and hidden cols 120..127 are
    # zero (the padded spatial lanes that survive BN+ReLU hit zero weights).
    w1r = w1.reshape(HID, COUT, S).transpose(1, 2, 0)               # (5, 196, 120)
    w1p = jnp.zeros((COUT, SPAD, HPAD), jnp.float32).at[:, :S, :HID].set(w1r)
    w1p = w1p.reshape(COUT * SPAD, HPAD).astype(jnp.bfloat16)       # (1280, 128)
    b1p = jnp.zeros((1, HPAD), jnp.float32).at[0, :HID].set(b1)

    # W2 (10, 120) -> (HPAD=128, CLSPAD=128) f32, natural (K, N) layout;
    # padded class lanes get bias -1e30 so the lane-dense softmax ignores them.
    w2p = jnp.zeros((HPAD, CLSPAD), jnp.float32).at[:HID, :NCLS].set(w2.T)
    b2p = jnp.full((1, CLSPAD), -1e30, jnp.float32).at[0, :NCLS].set(b2)
    return (wc, scale8, bias8, w1p, b1p, w2p, b2p)


# ---------------------------------------------------------------------------
# Forward wrapper: phase-major im2col layout plumbing + single pallas_call
# ---------------------------------------------------------------------------
def mnist_forward(x, kparams):
    wc, scale8, bias8, w1p, b1p, w2p, b2p = kparams
    x = x.astype(jnp.float32)
    nb = x.shape[0]

    # zero-pad (padding=2) and build the phase-major im2col patch matrix:
    # pmat[k, (p*B + b)*256 + s]; only 36 distinct shifted views exist.
    xpad = jnp.pad(x[:, 0], ((0, 0), (2, 2), (2, 2)))               # (B, 32, 32)
    views = {}
    for u in range(2 + K - 1):
        for v in range(2 + K - 1):
            views[(u, v)] = xpad[:, u:u + 27:2, v:v + 27:2].reshape(nb, S)

    phase_planes = []
    for ph in range(2):
        for pw in range(2):
            taps = [views[(ph + kh, pw + kw)]
                    for kh in range(K) for kw in range(K)]
            phase_planes.append(jnp.stack(taps, axis=0))            # (25, B, 196)
    pmat = jnp.stack(phase_planes, axis=1)                          # (25, 4, B, 196)
    pmat = jnp.pad(pmat, ((0, KPAD - K * K), (0, 0), (0, 0), (0, SPAD - S)))
    pmat = pmat.reshape(KPAD, 4 * nb * SPAD).astype(jnp.bfloat16)   # (32, 4*B*256)

    # Grid-less single call: at B=2 all operands (~0.6 MiB total, bf16 patches
    # and W1) are VMEM-resident.  For large B: grid=(B,), per-sample patch
    # BlockSpec, constant weight index_maps, dimension_semantics=("parallel",).
    probs_pad = pl.pallas_call(
        mnist_fused_kernel,
        out_shape=jax.ShapeDtypeStruct((nb, CLSPAD), jnp.float32),
        in_specs=[pl.BlockSpec(memory_space=pltpu.MemorySpace.VMEM)] * 8,
        out_specs=pl.BlockSpec(memory_space=pltpu.MemorySpace.VMEM),
    )(pmat, wc, scale8, bias8, w1p, b1p, w2p, b2p)
    return probs_pad[:, :NCLS]


# ---------------------------------------------------------------------------
# Deterministic parameter init (shapes from mnist_model.__init__)
# ---------------------------------------------------------------------------
def init_params(key):
    ks = jax.random.split(key, 9)
    conv_w = 0.2 * jax.random.normal(ks[0], (COUT, CIN, K, K), jnp.float32)
    gamma = 1.0 + 0.1 * jax.random.normal(ks[1], (COUT,), jnp.float32)
    beta = 0.1 * jax.random.normal(ks[2], (COUT,), jnp.float32)
    run_mean = 0.1 * jax.random.normal(ks[3], (COUT,), jnp.float32)
    run_var = jax.random.uniform(ks[4], (COUT,), jnp.float32, 0.5, 1.5)
    w1 = jax.random.normal(ks[5], (HID, FEAT), jnp.float32) / np.sqrt(FEAT)
    b1 = 0.01 * jax.random.normal(ks[6], (HID,), jnp.float32)
    w2 = jax.random.normal(ks[7], (NCLS, HID), jnp.float32) / np.sqrt(HID)
    b2 = 0.01 * jax.random.normal(ks[8], (NCLS,), jnp.float32)
    return (conv_w, gamma, beta, run_mean, run_var, w1, b1, w2, b2)


# ---------------------------------------------------------------------------
# Pure-JAX reference (correctness check only)
# ---------------------------------------------------------------------------
def reference_forward(x, params):
    conv_w, gamma, beta, run_mean, run_var, w1, b1, w2, b2 = params
    x = x.astype(jnp.float32)
    hi = jax.lax.Precision.HIGHEST
    conv = jax.lax.conv_general_dilated(
        x, conv_w, (1, 1), ((2, 2), (2, 2)),
        dimension_numbers=('NCHW', 'OIHW', 'NCHW'), precision=hi)
    scale = (gamma / jnp.sqrt(run_var + BN_EPS))[None, :, None, None]
    shift = beta[None, :, None, None] - run_mean[None, :, None, None] * scale
    bn = conv * scale + shift
    mp = jax.lax.reduce_window(bn, -jnp.inf, jax.lax.max,
                               (1, 1, 2, 2), (1, 1, 2, 2), 'VALID')
    r = jnp.maximum(mp, 0.0)
    flat = r.reshape(r.shape[0], -1)
    d1 = jnp.maximum(jnp.dot(flat, w1.T, precision=hi) + b1, 0.0)
    d2 = jnp.dot(d1, w2.T, precision=hi) + b2
    return jax.nn.softmax(d2, axis=1)


if __name__ == "__main__":
    key = jax.random.PRNGKey(0)
    kx, kp = jax.random.split(key)
    x = jax.random.normal(kx, (B, CIN, H, W), jnp.float32)
    params = init_params(kp)

    kparams = prepare_params(params)        # one-time weight layout / BN fold
    fwd = jax.jit(mnist_forward)
    out = jax.block_until_ready(fwd(x, kparams))

    ref = reference_forward(x, params)
    assert out.shape == (B, NCLS)
    # bf16 storage of patches / conv weights / W1 (perf-review DMA item) relaxes
    # the previous all-f32 tolerance of 2e-3 to 5e-3 on softmax probabilities.
    np.testing.assert_allclose(np.asarray(out), np.asarray(ref), atol=5e-3, rtol=0)
    print("KERNEL_OK")
</pallas_src>

<mosaic_0001>
module attributes {stable_mosaic.version = 11 : i64} {
  func.func @mnist_fused_kernel(%arg0: memref<32x2048xbf16, #tpu.memory_space<vmem>>, %arg1: memref<8x32xbf16, #tpu.memory_space<vmem>>, %arg2: memref<8x1xf32, #tpu.memory_space<vmem>>, %arg3: memref<8x1xf32, #tpu.memory_space<vmem>>, %arg4: memref<1280x128xbf16, #tpu.memory_space<vmem>>, %arg5: memref<1x128xf32, #tpu.memory_space<vmem>>, %arg6: memref<128x128xf32, #tpu.memory_space<vmem>>, %arg7: memref<1x128xf32, #tpu.memory_space<vmem>>, %arg8: memref<2x128xf32, #tpu.memory_space<vmem>>) attributes {dimension_semantics = [], scalar_prefetch = 0 : i64, scratch_operands = 0 : i64, tpu.core_type = #tpu.core_type<tc>} {
    %c0 = arith.constant 0 : index
    %c0_0 = arith.constant 0 : index
    %0 = vector.load %arg1[%c0, %c0_0] : memref<8x32xbf16, #tpu.memory_space<vmem>>, vector<8x32xbf16>
    %c0_1 = arith.constant 0 : index
    %c0_2 = arith.constant 0 : index
    %1 = vector.load %arg0[%c0_1, %c0_2] : memref<32x2048xbf16, #tpu.memory_space<vmem>>, vector<32x2048xbf16>
    %cst = arith.constant dense<0.000000e+00> : vector<8x2048xf32>
    %2 = tpu.matmul %0, %1, %cst {dimension_numbers = #tpu.dot_dimension_numbers<[1], [0], [0], [1], [0, 0, 1, 1], [], []>} : vector<8x32xbf16>, vector<32x2048xbf16>, vector<8x2048xf32> -> vector<8x2048xf32>
    %c0_3 = arith.constant 0 : index
    %c0_4 = arith.constant 0 : index
    %3 = vector.load %arg2[%c0_3, %c0_4] : memref<8x1xf32, #tpu.memory_space<vmem>>, vector<8x1xf32>
    %4 = vector.broadcast %3 : vector<8x1xf32> to vector<8x2048xf32>
    %5 = arith.mulf %2, %4 : vector<8x2048xf32>
    %c0_5 = arith.constant 0 : index
    %c0_6 = arith.constant 0 : index
    %6 = vector.load %arg3[%c0_5, %c0_6] : memref<8x1xf32, #tpu.memory_space<vmem>>, vector<8x1xf32>
    %7 = vector.broadcast %6 : vector<8x1xf32> to vector<8x2048xf32>
    %8 = arith.addf %5, %7 : vector<8x2048xf32>
    %9 = vector.extract_strided_slice %8 {offsets = [0, 0], sizes = [8, 512], strides = [1, 1]} : vector<8x2048xf32> to vector<8x512xf32>
    %10 = vector.extract_strided_slice %8 {offsets = [0, 512], sizes = [8, 512], strides = [1, 1]} : vector<8x2048xf32> to vector<8x512xf32>
    %11 = arith.maximumf %9, %10 : vector<8x512xf32>
    %12 = vector.extract_strided_slice %8 {offsets = [0, 1024], sizes = [8, 512], strides = [1, 1]} : vector<8x2048xf32> to vector<8x512xf32>
    %13 = vector.extract_strided_slice %8 {offsets = [0, 1536], sizes = [8, 512], strides = [1, 1]} : vector<8x2048xf32> to vector<8x512xf32>
    %14 = arith.maximumf %12, %13 : vector<8x512xf32>
    %15 = arith.maximumf %11, %14 : vector<8x512xf32>
    %cst_7 = arith.constant 0.000000e+00 : f32
    %16 = vector.broadcast %cst_7 : f32 to vector<8x512xf32>
    %17 = arith.maximumf %15, %16 : vector<8x512xf32>
    %18 = vector.extract_strided_slice %17 {offsets = [0, 0], sizes = [8, 256], strides = [1, 1]} : vector<8x512xf32> to vector<8x256xf32>
    %19 = vector.extract_strided_slice %18 {offsets = [0, 0], sizes = [1, 256], strides = [1, 1]} : vector<8x256xf32> to vector<1x256xf32>
    %20 = vector.extract_strided_slice %18 {offsets = [1, 0], sizes = [1, 256], strides = [1, 1]} : vector<8x256xf32> to vector<1x256xf32>
    %21 = vector.extract_strided_slice %18 {offsets = [2, 0], sizes = [1, 256], strides = [1, 1]} : vector<8x256xf32> to vector<1x256xf32>
    %22 = vector.extract_strided_slice %18 {offsets = [3, 0], sizes = [1, 256], strides = [1, 1]} : vector<8x256xf32> to vector<1x256xf32>
    %23 = vector.extract_strided_slice %18 {offsets = [4, 0], sizes = [1, 256], strides = [1, 1]} : vector<8x256xf32> to vector<1x256xf32>
    %24 = tpu.concatenate %19, %20, %21, %22, %23 in 1 : vector<1x256xf32>, vector<1x256xf32>, vector<1x256xf32>, vector<1x256xf32>, vector<1x256xf32> -> vector<1x1280xf32>
    %25 = vector.extract_strided_slice %17 {offsets = [0, 256], sizes = [8, 256], strides = [1, 1]} : vector<8x512xf32> to vector<8x256xf32>
    %26 = vector.extract_strided_slice %25 {offsets = [0, 0], sizes = [1, 256], strides = [1, 1]} : vector<8x256xf32> to vector<1x256xf32>
    %27 = vector.extract_strided_slice %25 {offsets = [1, 0], sizes = [1, 256], strides = [1, 1]} : vector<8x256xf32> to vector<1x256xf32>
    %28 = vector.extract_strided_slice %25 {offsets = [2, 0], sizes = [1, 256], strides = [1, 1]} : vector<8x256xf32> to vector<1x256xf32>
    %29 = vector.extract_strided_slice %25 {offsets = [3, 0], sizes = [1, 256], strides = [1, 1]} : vector<8x256xf32> to vector<1x256xf32>
    %30 = vector.extract_strided_slice %25 {offsets = [4, 0], sizes = [1, 256], strides = [1, 1]} : vector<8x256xf32> to vector<1x256xf32>
    %31 = tpu.concatenate %26, %27, %28, %29, %30 in 1 : vector<1x256xf32>, vector<1x256xf32>, vector<1x256xf32>, vector<1x256xf32>, vector<1x256xf32> -> vector<1x1280xf32>
    %32 = tpu.concatenate %24, %31 in 0 : vector<1x1280xf32>, vector<1x1280xf32> -> vector<2x1280xf32>
    %33 = arith.truncf %32 : vector<2x1280xf32> to vector<2x1280xbf16>
    %c0_8 = arith.constant 0 : index
    %c0_9 = arith.constant 0 : index
    %34 = vector.load %arg4[%c0_8, %c0_9] : memref<1280x128xbf16, #tpu.memory_space<vmem>>, vector<1280x128xbf16>
    %cst_10 = arith.constant dense<0.000000e+00> : vector<2x128xf32>
    %35 = tpu.matmul %33, %34, %cst_10 {dimension_numbers = #tpu.dot_dimension_numbers<[1], [0], [0], [1], [0, 0, 1, 1], [], []>} : vector<2x1280xbf16>, vector<1280x128xbf16>, vector<2x128xf32> -> vector<2x128xf32>
    %c0_11 = arith.constant 0 : index
    %c0_12 = arith.constant 0 : index
    %36 = vector.load %arg5[%c0_11, %c0_12] : memref<1x128xf32, #tpu.memory_space<vmem>>, vector<1x128xf32>
    %37 = vector.broadcast %36 : vector<1x128xf32> to vector<2x128xf32>
    %38 = arith.addf %35, %37 : vector<2x128xf32>
    %cst_13 = arith.constant 0.000000e+00 : f32
    %39 = vector.broadcast %cst_13 : f32 to vector<2x128xf32>
    %40 = arith.maximumf %38, %39 : vector<2x128xf32>
    %c0_14 = arith.constant 0 : index
    %c0_15 = arith.constant 0 : index
    %41 = vector.load %arg6[%c0_14, %c0_15] : memref<128x128xf32, #tpu.memory_space<vmem>>, vector<128x128xf32>
    %cst_16 = arith.constant dense<0.000000e+00> : vector<2x128xf32>
    %42 = tpu.matmul %40, %41, %cst_16 {dimension_numbers = #tpu.dot_dimension_numbers<[1], [0], [0], [1], [0, 0, 1, 1], [], []>} : vector<2x128xf32>, vector<128x128xf32>, vector<2x128xf32> -> vector<2x128xf32>
    %c0_17 = arith.constant 0 : index
    %c0_18 = arith.constant 0 : index
    %43 = vector.load %arg7[%c0_17, %c0_18] : memref<1x128xf32, #tpu.memory_space<vmem>>, vector<1x128xf32>
    %44 = vector.broadcast %43 : vector<1x128xf32> to vector<2x128xf32>
    %45 = arith.addf %42, %44 : vector<2x128xf32>
    %cst_19 = arith.constant dense<0xFF800000> : vector<2xf32>
    %46 = vector.multi_reduction <maximumf>, %45, %cst_19 [1] : vector<2x128xf32> to vector<2xf32>
    %47 = vector.shape_cast %46 : vector<2xf32> to vector<2x1xf32>
    %48 = vector.broadcast %47 : vector<2x1xf32> to vector<2x128xf32>
    %49 = arith.subf %45, %48 : vector<2x128xf32>
    %50 = math.exp %49 : vector<2x128xf32>
    %cst_20 = arith.constant dense<0.000000e+00> : vector<2xf32>
    %51 = vector.multi_reduction <add>, %50, %cst_20 [1] : vector<2x128xf32> to vector<2xf32>
    %52 = vector.shape_cast %51 : vector<2xf32> to vector<2x1xf32>
    %53 = tpu.reciprocal %52 : vector<2x1xf32> -> vector<2x1xf32>
    %54 = vector.broadcast %53 : vector<2x1xf32> to vector<2x128xf32>
    %55 = arith.mulf %50, %54 : vector<2x128xf32>
    %c0_21 = arith.constant 0 : index
    %c0_22 = arith.constant 0 : index
    %56 = vector.load %arg8[%c0_21, %c0_22] : memref<2x128xf32, #tpu.memory_space<vmem>>, vector<2x128xf32>
    tpu.vector_store %arg8[%c0_21, %c0_22], %55 {strides = array<i32>} : memref<2x128xf32, #tpu.memory_space<vmem>>, vector<2x128xf32>,
    return
  }
}

</mosaic_0001>

<bundles_post_ra>
// kernel: mnist_forward.1
= control target key start
LH: loop header
LB: loop body
LE: loop exit
PB: predicated region body
PF: predicated region fallthrough
CT: control target
= control target key end

     0   :  { %v2083_v8 = vmov 0   ;;  %vm224_vm0 = vcmask 261120   ;;  %s2597_s0 = inlined_call_operand.vmem [shape: bf16[32,2048], index: 0, kind: input, shape index: {}]   ;;  %s2598_s1 = inlined_call_operand.vmem [shape: bf16[8,32], index: 1, kind: input, shape index: {}]   ;;  %s2599_s2 = inlined_call_operand.vmem [shape: f32[8,1], index: 2, kind: input, shape index: {}]   ;;  %s2600_s3 = inlined_call_operand.vmem [shape: f32[8,1], index: 3, kind: input, shape index: {}]   ;;  %s2601_s4 = inlined_call_operand.vmem [shape: bf16[1280,128], index: 4, kind: input, shape index: {}]   ;;  %s2602_s5 = inlined_call_operand.vmem [shape: f32[1,128], index: 5, kind: input, shape index: {}]   ;;  %s2603_s6 = inlined_call_operand.vmem [shape: f32[128,128], index: 6, kind: input, shape index: {}]   ;;  %s2604_s7 = inlined_call_operand.vmem [shape: f32[1,128], index: 7, kind: input, shape index: {}]   ;;  %s2605_s8 = inlined_call_operand.hbm [shape: f32[2,128], index: 8, kind: output, shape index: {}]  }
   0x1   :  { %v32_v0 = vld [vmem:[%s2597_s0] sm:$0xff]  ;;  %v33_v2 = vld [vmem:[%s2597_s0 + $0x8] sm:$0xff]  ;;  %260 = vmatprep.mubr.bf16.mxu0 %v2083_v8  ;;  %301 = vmatprep.mubr.bf16.mxu1 %v2083_v8  ;;  %v34_v15 = vld [vmem:[%s2597_s0 + $0x10] sm:$0xff] }
   0x2   :  { %v40_v1 = vld [vmem:[%s2597_s0 + $0x40] sm:$0xff]  ;;  %v41_v4 = vld [vmem:[%s2597_s0 + $0x48] sm:$0xff]  ;;  %1974 = vset.pattern.permute.xlu0 %v2083_v8  ;;  %v42_v16 = vld [vmem:[%s2597_s0 + $0x50] sm:$0xff] }
   0x3   :  { %v1654_v3 = vcombine.high %v32_v0, %v40_v1  ;;  %v1653_v5 = vcombine.low %v32_v0, %v40_v1  ;;  %v48_v6 = vld [vmem:[%s2597_s0 + $0x80] sm:$0xff]  ;;  %v1656_v9 = vcombine.high %v33_v2, %v41_v4  ;;  %v1655_v10 = vcombine.low %v33_v2, %v41_v4  ;;  %v49_v12 = vld [vmem:[%s2597_s0 + $0x88] sm:$0xff]  ;;  %v35_v17 = vld [vmem:[%s2597_s0 + $0x18] sm:$0xff] }
   0x4   :  { %v56_v7 = vld [vmem:[%s2597_s0 + $0xc0] sm:$0xff]  ;;  %v57_v13 = vld [vmem:[%s2597_s0 + $0xc8] sm:$0xff]  ;;  %v43_v19 = vld [vmem:[%s2597_s0 + $0x58] sm:$0xff]  ;;  %v1658_v21 = vcombine.high %v34_v15, %v42_v16  ;;  %v1657_v28 = vcombine.low %v34_v15, %v42_v16 }
   0x5   :  { %v1670_v11 = vcombine.high %v48_v6, %v56_v7  ;;  %228 = vmatprep.subr.bf16.mxu0 %v1654_v3  ;;  %v1672_v14 = vcombine.high %v49_v12, %v57_v13  ;;  %269 = vmatprep.subr.bf16.mxu1 %v1656_v9  ;;  %v1669_v18 = vcombine.low %v48_v6, %v56_v7  ;;  %v50_v23 = vld [vmem:[%s2597_s0 + $0x90] sm:$0xff]  ;;  %v51_v25 = vld [vmem:[%s2597_s0 + $0x98] sm:$0xff]  ;;  %v2187_v27 = vld [vmem:[%s2598_s1] sm:$0xf] }
   0x6   :  { %229 = vmatpush1.bf16.msra.mxu0 %v1653_v5  ;;  %270 = vmatpush1.bf16.msra.mxu1 %v1655_v10  ;;  %v1671_v20 = vcombine.low %v49_v12, %v57_v13  ;;  %v1660_v22 = vcombine.high %v35_v17, %v43_v19  ;;  %v58_v24 = vld [vmem:[%s2597_s0 + $0xd0] sm:$0xff]  ;;  %v59_v26 = vld [vmem:[%s2597_s0 + $0xd8] sm:$0xff]  ;;  %v1659_v29 = vcombine.low %v35_v17, %v43_v19  ;;  %v36_v32 = vld [vmem:[%s2597_s0 + $0x20] sm:$0xff] }
   0x7   :  { %230 = vmatprep.subr.bf16.mxu0 %v1670_v11  ;;  %271 = vmatprep.subr.bf16.mxu1 %v1672_v14  ;;  %v1674_v30 = vcombine.high %v50_v23, %v58_v24  ;;  %v1676_v31 = vcombine.high %v51_v25, %v59_v26  ;;  %v44_v33 = vld [vmem:[%s2597_s0 + $0x60] sm:$0xff]  ;;  %v37_v34 = vld [vmem:[%s2597_s0 + $0x28] sm:$0xff]  ;;  %v1673_v37 = vcombine.low %v50_v23, %v58_v24  ;;  %v38_v47 = vld [vmem:[%s2597_s0 + $0x30] sm:$0xff] }
   0x8   :  { %v45_v35 = vld [vmem:[%s2597_s0 + $0x68] sm:$0xff]  ;;  %v556_v36 = vld [vmem:[%s2599_s2] sm:$0xff]  ;;  %v1675_v40 = vcombine.low %v51_v25, %v59_v26  ;;  %v1662_v41 = vcombine.high %v36_v32, %v44_v33  ;;  %v1661_v46 = vcombine.low %v36_v32, %v44_v33  ;;  %v46_v48 = vld [vmem:[%s2597_s0 + $0x70] sm:$0xff] }
   0x9   :  { %v52_v38 = vld [vmem:[%s2597_s0 + $0xa0] sm:$0xff]  ;;  %v53_v42 = vld [vmem:[%s2597_s0 + $0xa8] sm:$0xff]  ;;  %v1664_v44 = vcombine.high %v37_v34, %v45_v35  ;;  %559 = vperm.xlu0 %1974, %v556_v36   ;;  %v1663_v49 = vcombine.low %v37_v34, %v45_v35  ;;  %v39_v51 = vld [vmem:[%s2597_s0 + $0x38] sm:$0xff]  ;;  %v1666_v58 = vcombine.high %v38_v47, %v46_v48  ;;  %v1665_v62 = vcombine.low %v38_v47, %v46_v48 }
   0xa   :  { %231 = vmatpush1.bf16.msra.mxu0 %v1669_v18  ;;  %272 = vmatpush1.bf16.msra.mxu1 %v1671_v20  ;;  %v60_v39 = vld [vmem:[%s2597_s0 + $0xe0] sm:$0xff]  ;;  %v61_v43 = vld [vmem:[%s2597_s0 + $0xe8] sm:$0xff]  ;;  %v47_v52 = vld [vmem:[%s2597_s0 + $0x78] sm:$0xff] }
   0xb   :  { %310 = vmatprep.subr.bf16.mxu0 %v1658_v21  ;;  %351 = vmatprep.subr.bf16.mxu1 %v1660_v22  ;;  %v578_v45 = vld [vmem:[%s2600_s3] sm:$0xff]  ;;  %v1678_v50 = vcombine.high %v52_v38, %v60_v39  ;;  %v1680_v53 = vcombine.high %v53_v42, %v61_v43  ;;  %v1677_v54 = vcombine.low %v52_v38, %v60_v39  ;;  %v54_v55 = vld [vmem:[%s2597_s0 + $0xb0] sm:$0xff]  ;;  %v55_v59 = vld [vmem:[%s2597_s0 + $0xb8] sm:$0xff] }
   0xc   :  { %v62_v56 = vld [vmem:[%s2597_s0 + $0xf0] sm:$0xff]  ;;  %v1679_v57 = vcombine.low %v53_v42, %v61_v43  ;;  %v63_v60 = vld [vmem:[%s2597_s0 + $0xf8] sm:$0xff]  ;;  %v1668_v61 = vcombine.high %v39_v51, %v47_v52  ;;  %v1667_v63 = vcombine.low %v39_v51, %v47_v52 }
   0xd   :  { %1685 = vmatmul.mubr.msk.bf16.vlgmr.msra.gmra.mrb[0].mxu0 %vm224_vm0, %v2187_v27  ;;  %1686 = vmatmul.mubr.msk.bf16.vlgmr.msra.gmra.mrb[0].mxu1 %vm224_vm0, %v2187_v27  ;;  %v1682_v0 = vcombine.high %v54_v55, %v62_v56  ;;  %v1684_v1 = vcombine.high %v55_v59, %v63_v60  ;;  %v1681_v2 = vcombine.low %v54_v55, %v62_v56 }
   0xe   :  { %311 = vmatpush1.bf16.msra.mxu0 %v1657_v28  ;;  %352 = vmatpush1.bf16.msra.mxu1 %v1659_v29  ;;  %v1683_v3 = vcombine.low %v55_v59, %v63_v60 }
   0xf   :  { %312 = vmatprep.subr.bf16.mxu0 %v1674_v30  ;;  %353 = vmatprep.subr.bf16.mxu1 %v1676_v31 }
  0x10   :  { %342 = vmatprep.mubr.bf16.mxu0 %v2083_v8  ;;  %383 = vmatprep.mubr.bf16.mxu1 %v2083_v8 }
  0x11   :  { %581 = vperm.xlu0 %1974, %v578_v45  }
  0x12   :  { %313 = vmatpush1.bf16.msra.mxu0 %v1673_v37  ;;  %354 = vmatpush1.bf16.msra.mxu1 %v1675_v40 }
  0x13   :  { %392 = vmatprep.subr.bf16.mxu0 %v1662_v41  ;;  %433 = vmatprep.subr.bf16.mxu1 %v1664_v44 }
  0x15   :  { %1687 = vmatmul.mubr.msk.bf16.vlgmr.msra.gmra.mrb[4].mxu0 %vm224_vm0, %v2187_v27  ;;  %1688 = vmatmul.mubr.msk.bf16.vlgmr.msra.gmra.mrb[4].mxu1 %vm224_vm0, %v2187_v27 }
  0x16   :  { %393 = vmatpush1.bf16.msra.mxu0 %v1661_v46  ;;  %434 = vmatpush1.bf16.msra.mxu1 %v1663_v49 }
  0x17   :  { %394 = vmatprep.subr.bf16.mxu0 %v1678_v50  ;;  %435 = vmatprep.subr.bf16.mxu1 %v1680_v53 }
  0x18   :  { %424 = vmatprep.mubr.bf16.mxu0 %v2083_v8  ;;  %465 = vmatprep.mubr.bf16.mxu1 %v2083_v8 }
  0x1a   :  { %395 = vmatpush1.bf16.msra.mxu0 %v1677_v54  ;;  %436 = vmatpush1.bf16.msra.mxu1 %v1679_v57 }
  0x1b   :  { %474 = vmatprep.subr.bf16.mxu0 %v1666_v58  ;;  %515 = vmatprep.subr.bf16.mxu1 %v1668_v61 }
  0x1d   :  { %1689 = vmatmul.mubr.msk.bf16.vlgmr.msra.gmra.mrb[8].mxu0 %vm224_vm0, %v2187_v27  ;;  %1690 = vmatmul.mubr.msk.bf16.vlgmr.msra.gmra.mrb[8].mxu1 %vm224_vm0, %v2187_v27 }
  0x1e   :  { %475 = vmatpush1.bf16.msra.mxu0 %v1665_v62  ;;  %516 = vmatpush1.bf16.msra.mxu1 %v1667_v63 }
  0x1f   :  { %476 = vmatprep.subr.bf16.mxu0 %v1682_v0  ;;  %517 = vmatprep.subr.bf16.mxu1 %v1684_v1 }
  0x20   :  { %506 = vmatprep.mubr.bf16.mxu0 %v2083_v8  ;;  %547 = vmatprep.mubr.bf16.mxu1 %v2083_v8 }
  0x22   :  { %477 = vmatpush1.bf16.msra.mxu0 %v1681_v2  ;;  %518 = vmatpush1.bf16.msra.mxu1 %v1683_v3 }
  0x25   :  { %1691 = vmatmul.mubr.msk.bf16.vlgmr.msra.gmra.mrb[12].mxu0 %vm224_vm0, %v2187_v27  ;;  %1692 = vmatmul.mubr.msk.bf16.vlgmr.msra.gmra.mrb[12].mxu1 %vm224_vm0, %v2187_v27 }
  0x26   :  { %13 = vsyncpa [#allocation3], 0  ;;  %v1975_v4 = vld [vmem:[%s2601_s4 + $0x40] sm:$0xff]   ;;  %v1979_v8 = vld [vmem:[%s2601_s4 + $0x48] sm:$0xff]   ;;  %vm664_vm1 = vcmask 1040384   ;;  %vm2085_vm2 = vmmov 0  }
  0x27   :  { %v1976_v5 = vld [vmem:[%s2601_s4 + $0xc0] sm:$0xff]   ;;  %1783 = vmatprep.subr.bf16.mxu0 %v1975_v4  ;;  %v1980_v9 = vld [vmem:[%s2601_s4 + $0xc8] sm:$0xff]   ;;  %v1983_v12 = vld [vmem:[%s2601_s4 + $0x50] sm:$0xff]   ;;  %vm1626_vm3 = vcmask 1041408   ;;  %s2087_s13 = smov [#allocation2]  }
  0x28   :  { %v1977_v6 = vld [vmem:[%s2601_s4] sm:$0xff]   ;;  %1805 = vmatprep.subr.bf16.mxu1 %v1976_v5  ;;  %v1981_v10 = vld [vmem:[%s2601_s4 + $0x8] sm:$0xff]   ;;  %v1984_v13 = vld [vmem:[%s2601_s4 + $0xd0] sm:$0xff]   ;;  %s1645_s14 = sshll.u32 %s2087_s13, 4  ;;  %s1646_s14 = int_to_ptr.vmem [resolvable:$true] %s1645_s14 }
  0x29   :  { %v1978_v7 = vld [vmem:[%s2601_s4 + $0x80] sm:$0xff]   ;;  %1784 = vmatpush3.bf16.msra.mxu0 %v1977_v6  ;;  %v1982_v11 = vld [vmem:[%s2601_s4 + $0x88] sm:$0xff]   ;;  %v1985_v14 = vld [vmem:[%s2601_s4 + $0x10] sm:$0xff]   ;;  %p2064_p1 = scmp.lt.s32.totalorder %s1646_s14, %s1646_s14 }
  0x2a   :  { %1806 = vmatpush3.bf16.msra.mxu1 %v1978_v7  ;;  %1785 = vmatprep.subr.bf16.mxu0 %v1979_v8  ;;  %v1986_v15 = vld [vmem:[%s2601_s4 + $0x90] sm:$0xff]   ;;  %v1987_v16 = vld [vmem:[%s2601_s4 + $0x58] sm:$0xff]   ;;  %v1991_v20 = vld [vmem:[%s2601_s4 + $0x60] sm:$0xff]  }
  0x2b   :  { %1807 = vmatprep.subr.bf16.mxu1 %v1980_v9  ;;  %v1988_v17 = vld [vmem:[%s2601_s4 + $0xd8] sm:$0xff]   ;;  %v1992_v21 = vld [vmem:[%s2601_s4 + $0xe0] sm:$0xff]   ;;  %v1995_v24 = vld [vmem:[%s2601_s4 + $0x68] sm:$0xff]  }
  0x2c   :  { %v1989_v18 = vld [vmem:[%s2601_s4 + $0x18] sm:$0xff]   ;;  %v1993_v22 = vld [vmem:[%s2601_s4 + $0x20] sm:$0xff]   ;;  %v1996_v25 = vld [vmem:[%s2601_s4 + $0xe8] sm:$0xff]  }
  0x2d   :  { %1786 = vmatpush3.bf16.msra.mxu0 %v1981_v10  ;;  %v1990_v19 = vld [vmem:[%s2601_s4 + $0x98] sm:$0xff]   ;;  %v1994_v23 = vld [vmem:[%s2601_s4 + $0xa0] sm:$0xff]   ;;  %v1997_v26 = vld [vmem:[%s2601_s4 + $0x28] sm:$0xff]  }
  0x2e   :  { %1808 = vmatpush3.bf16.msra.mxu1 %v1982_v11  ;;  %1787 = vmatprep.subr.bf16.mxu0 %v1983_v12  ;;  %v1998_v27 = vld [vmem:[%s2601_s4 + $0xa8] sm:$0xff]   ;;  %v1999_v28 = vld [vmem:[%s2601_s4 + $0x70] sm:$0xff]   ;;  %v2003_v32 = vld [vmem:[%s2601_s4 + $0x78] sm:$0xff]  }
  0x2f   :  { %1809 = vmatprep.subr.bf16.mxu1 %v1984_v13  ;;  %v2000_v29 = vld [vmem:[%s2601_s4 + $0xf0] sm:$0xff]   ;;  %v2004_v33 = vld [vmem:[%s2601_s4 + $0xf8] sm:$0xff]   ;;  %v2007_v36 = vld [vmem:[%s2601_s4 + $0x140] sm:$0xff]  }
  0x30   :  { %v2001_v30 = vld [vmem:[%s2601_s4 + $0x30] sm:$0xff]   ;;  %v2005_v34 = vld [vmem:[%s2601_s4 + $0x38] sm:$0xff]   ;;  %v2008_v37 = vld [vmem:[%s2601_s4 + $0x1c0] sm:$0xff]  }
  0x31   :  { %1788 = vmatpush3.bf16.msra.mxu0 %v1985_v14  ;;  %v2002_v31 = vld [vmem:[%s2601_s4 + $0xb0] sm:$0xff]   ;;  %v2006_v35 = vld [vmem:[%s2601_s4 + $0xb8] sm:$0xff]  }
  0x32   :  { %1810 = vmatpush3.bf16.msra.mxu1 %v1986_v15  ;;  %1789 = vmatprep.subr.bf16.mxu0 %v1987_v16 }
  0x33   :  { %1811 = vmatprep.subr.bf16.mxu1 %v1988_v17 }
  0x35   :  { %1790 = vmatpush3.bf16.msra.mxu0 %v1989_v18 }
  0x36   :  { %1812 = vmatpush3.bf16.msra.mxu1 %v1990_v19  ;;  %1791 = vmatprep.subr.bf16.mxu0 %v1991_v20 }
  0x37   :  { %1813 = vmatprep.subr.bf16.mxu1 %v1992_v21 }
  0x39   :  { %1792 = vmatpush3.bf16.msra.mxu0 %v1993_v22 }
  0x3a   :  { %1814 = vmatpush3.bf16.msra.mxu1 %v1994_v23  ;;  %1793 = vmatprep.subr.bf16.mxu0 %v1995_v24 }
  0x3b   :  { %1815 = vmatprep.subr.bf16.mxu1 %v1996_v25 }
  0x3d   :  { %1794 = vmatpush3.bf16.msra.mxu0 %v1997_v26 }
  0x3e   :  { %1816 = vmatpush3.bf16.msra.mxu1 %v1998_v27  ;;  %1795 = vmatprep.subr.bf16.mxu0 %v1999_v28 }
  0x3f   :  { %1817 = vmatprep.subr.bf16.mxu1 %v2000_v29 }
  0x41   :  { %1796 = vmatpush3.bf16.msra.mxu0 %v2001_v30 }
  0x42   :  { %1818 = vmatpush3.bf16.msra.mxu1 %v2002_v31  ;;  %1797 = vmatprep.subr.bf16.mxu0 %v2003_v32 }
  0x43   :  { %1819 = vmatprep.subr.bf16.mxu1 %v2004_v33 }
  0x45   :  { %1798 = vmatpush3.bf16.msra.mxu0 %v2005_v34 }
  0x46   :  { %1820 = vmatpush3.bf16.msra.mxu1 %v2006_v35  ;;  %1827 = vmatprep.subr.bf16.mxu0 %v2007_v36 }
  0x47   :  { %1849 = vmatprep.subr.bf16.mxu1 %v2008_v37 }
  0x88   :  { %v560_v38 = vpop.permute.xlu0 %559 }
  0x90   :  { %v582_v50 = vpop.permute.xlu0 %581 }
  0xe0   :  { %v262_v39 = vpop.f32.mrb[0].mxu0  ;;  %v303_v40 = vpop.f32.mrb[0].mxu1 }
  0xe1   :  { %v264_v41 = vpop.f32.mrb[1].mxu0  ;;  %v305_v42 = vpop.f32.mrb[1].mxu1  ;;  %v562_v47 = vmul.f32 %v560_v38, %v262_v39  ;;  %v564_v48 = vmul.f32 %v560_v38, %v303_v40 }
  0xe2   :  { %v266_v43 = vpop.f32.mrb[2].mxu0  ;;  %v307_v44 = vpop.f32.mrb[2].mxu1  ;;  %v563_v49 = vmul.f32 %v560_v38, %v264_v41  ;;  %v565_v52 = vmul.f32 %v560_v38, %v305_v42 }
  0xe3   :  { %v267_v45 = vpop.f32.mrb[3].mxu0  ;;  %v308_v46 = vpop.f32.mrb[3].mxu1  ;;  %v584_v60 = vadd.f32 %v582_v50, %v562_v47  ;;  %v586_v1 = vadd.f32 %v582_v50, %v564_v48 }
  0xe4   :  { %v585_v3 = vadd.f32 %v582_v50, %v563_v49  ;;  %v587_v7 = vadd.f32 %v582_v50, %v565_v52 }
  0xe8   :  { %v344_v51 = vpop.f32.mrb[4].mxu0  ;;  %v385_v54 = vpop.f32.mrb[4].mxu1 }
  0xe9   :  { %v566_v53 = vmul.f32 %v560_v38, %v344_v51  ;;  %v346_v55 = vpop.f32.mrb[5].mxu0  ;;  %v568_v56 = vmul.f32 %v560_v38, %v385_v54  ;;  %v387_v58 = vpop.f32.mrb[5].mxu1 }
  0xea   :  { %v567_v57 = vmul.f32 %v560_v38, %v346_v55  ;;  %v348_v59 = vpop.f32.mrb[6].mxu0  ;;  %v569_v62 = vmul.f32 %v560_v38, %v387_v58  ;;  %v389_v63 = vpop.f32.mrb[6].mxu1 }
  0xeb   :  { %v588_v61 = vadd.f32 %v582_v50, %v566_v53  ;;  %v349_v0 = vpop.f32.mrb[7].mxu0  ;;  %v590_v2 = vadd.f32 %v582_v50, %v568_v56  ;;  %v390_v5 = vpop.f32.mrb[7].mxu1 }
  0xec   :  { %v589_v4 = vadd.f32 %v582_v50, %v567_v57  ;;  %v591_v8 = vadd.f32 %v582_v50, %v569_v62 }
  0xed   :  { %v600_v6 = vmax.f32 %v584_v60, %v588_v61  ;;  %v602_v9 = vmax.f32 %v586_v1, %v590_v2 }
  0xee   :  { %v601_v10 = vmax.f32 %v585_v3, %v589_v4  ;;  %v603_v11 = vmax.f32 %v587_v7, %v591_v8  ;;  %v2010_v7 = vld [vmem:[%s2601_s4 + $0x180] sm:$0xff]  }
  0xf0   :  { %v426_v12 = vpop.f32.mrb[8].mxu0  ;;  %v467_v13 = vpop.f32.mrb[8].mxu1 }
  0xf1   :  { %v428_v14 = vpop.f32.mrb[9].mxu0  ;;  %v469_v15 = vpop.f32.mrb[9].mxu1  ;;  %v570_v20 = vmul.f32 %v560_v38, %v426_v12  ;;  %v572_v21 = vmul.f32 %v560_v38, %v467_v13  ;;  %v2009_v12 = vld [vmem:[%s2601_s4 + $0x100] sm:$0xff]  }
  0xf2   :  { %v430_v16 = vpop.f32.mrb[10].mxu0  ;;  %v471_v17 = vpop.f32.mrb[10].mxu1  ;;  %v571_v22 = vmul.f32 %v560_v38, %v428_v14  ;;  %v573_v24 = vmul.f32 %v560_v38, %v469_v15 }
  0xf3   :  { %v431_v18 = vpop.f32.mrb[11].mxu0  ;;  %v472_v19 = vpop.f32.mrb[11].mxu1  ;;  %v592_v32 = vadd.f32 %v582_v50, %v570_v20  ;;  %v594_v37 = vadd.f32 %v582_v50, %v572_v21  ;;  %v2011_v16 = vld [vmem:[%s2601_s4 + $0x148] sm:$0xff]  }
  0xf4   :  { %v593_v39 = vadd.f32 %v582_v50, %v571_v22  ;;  %v595_v43 = vadd.f32 %v582_v50, %v573_v24  ;;  %v2012_v20 = vld [vmem:[%s2601_s4 + $0x1c8] sm:$0xff]  }
  0xf8   :  { %v508_v23 = vpop.f32.mrb[12].mxu0  ;;  %v549_v26 = vpop.f32.mrb[12].mxu1 }
  0xf9   :  { %v574_v25 = vmul.f32 %v560_v38, %v508_v23  ;;  %v510_v27 = vpop.f32.mrb[13].mxu0  ;;  %v576_v28 = vmul.f32 %v560_v38, %v549_v26  ;;  %v551_v30 = vpop.f32.mrb[13].mxu1 }
  0xfa   :  { %v575_v29 = vmul.f32 %v560_v38, %v510_v27  ;;  %v512_v31 = vpop.f32.mrb[14].mxu0  ;;  %v577_v34 = vmul.f32 %v560_v38, %v551_v30  ;;  %v553_v35 = vpop.f32.mrb[14].mxu1  ;;  %v2013_v27 = vld [vmem:[%s2601_s4 + $0x108] sm:$0xff]  }
  0xfb   :  { %v596_v33 = vadd.f32 %v582_v50, %v574_v25  ;;  %v513_v36 = vpop.f32.mrb[15].mxu0  ;;  %v598_v40 = vadd.f32 %v582_v50, %v576_v28  ;;  %v554_v42 = vpop.f32.mrb[15].mxu1  ;;  %v2014_v25 = vld [vmem:[%s2601_s4 + $0x188] sm:$0xff]   ;;  %v2016_v28 = vld [vmem:[%s2601_s4 + $0x1d0] sm:$0xff]   ;;  %v2019_v35 = vld [vmem:[%s2601_s4 + $0x158] sm:$0xff]  }
  0xfc   :  { %v597_v41 = vadd.f32 %v582_v50, %v575_v29  ;;  %v599_v45 = vadd.f32 %v582_v50, %v577_v34  ;;  %v2015_v31 = vld [vmem:[%s2601_s4 + $0x150] sm:$0xff]   ;;  %v2020_v34 = vld [vmem:[%s2601_s4 + $0x1d8] sm:$0xff]   ;;  %v2025_v42 = vld [vmem:[%s2601_s4 + $0x120] sm:$0xff]  }
  0xfd   :  { %v604_v44 = vmax.f32 %v592_v32, %v596_v33  ;;  %v606_v46 = vmax.f32 %v594_v37, %v598_v40  ;;  %v2018_v32 = vld [vmem:[%s2601_s4 + $0x190] sm:$0xff]   ;;  %v2022_v36 = vld [vmem:[%s2601_s4 + $0x198] sm:$0xff]   ;;  %v2023_v40 = vld [vmem:[%s2601_s4 + $0x160] sm:$0xff]  }
  0xfe   :  { %v605_v47 = vmax.f32 %v593_v39, %v597_v41  ;;  %v607_v49 = vmax.f32 %v595_v43, %v599_v45  ;;  %v2017_v33 = vld [vmem:[%s2601_s4 + $0x110] sm:$0xff]   ;;  %v2021_v37 = vld [vmem:[%s2601_s4 + $0x118] sm:$0xff]   ;;  %v2024_v39 = vld [vmem:[%s2601_s4 + $0x1e0] sm:$0xff]  }
  0xff   :  { %v608_v48 = vmax.f32 %v600_v6, %v604_v44  ;;  %v610_v51 = vmax.f32 %v602_v9, %v606_v46  ;;  %v2026_v41 = vld [vmem:[%s2601_s4 + $0x1a0] sm:$0xff]   ;;  %v2028_v43 = vld [vmem:[%s2601_s4 + $0x1e8] sm:$0xff]  }
 0x100   :  { %v609_v52 = vmax.f32 %v601_v10, %v605_v47  ;;  %v611_v54 = vmax.f32 %v603_v11, %v607_v49  ;;  %v2027_v44 = vld [vmem:[%s2601_s4 + $0x168] sm:$0xff]   ;;  %v2032_v47 = vld [vmem:[%s2601_s4 + $0x1f0] sm:$0xff]  }
 0x101   :  { %v612_v53 = vmax.f32 %v608_v48, 0.0  ;;  %v614_v55 = vmax.f32 %v610_v51, 0.0  ;;  %v2030_v45 = vld [vmem:[%s2601_s4 + $0x1a8] sm:$0xff]   ;;  %v2031_v48 = vld [vmem:[%s2601_s4 + $0x170] sm:$0xff]  }
 0x102   :  { %v613_v38 = vmax.f32 %v609_v52, 0.0  ;;  %v615_v56 = vmax.f32 %v611_v54, 0.0  ;;  %v2029_v46 = vld [vmem:[%s2601_s4 + $0x128] sm:$0xff]   ;;  %v2034_v49 = vld [vmem:[%s2601_s4 + $0x1b0] sm:$0xff]   ;;  %v2036_v52 = vld [vmem:[%s2601_s4 + $0x1f8] sm:$0xff]  }
 0x103   :  { %v618_v57 = vrot.slane %v612_v53, 1  ;;  %v622_v58 = vrot.slane %v612_v53, 2  ;;  %v644_v60 = vrot.slane %v614_v55, 7  ;;  %v1695_v4 = vrot.slane %v614_v55, 9  ;;  %v2033_v51 = vld [vmem:[%s2601_s4 + $0x130] sm:$0xff]   ;;  %v2038_v54 = vld [vmem:[%s2601_s4 + $0x1b8] sm:$0xff]  }
 0x104   :  { %v619_v59 = vrot.slane %v613_v38, 1  ;;  %v623_v61 = vrot.slane %v613_v38, 2  ;;  %v627_v62 = vrot.slane %v613_v38, 3  ;;  %v645_v63 = vrot.slane %v615_v56, 7 }
 0x105   :  { %v667_v50 = vsel %vm664_vm1, %v618_v57, %v614_v55  ;;  %v1696_v0 = vrot.slane %v615_v56, 9  ;;  %v1698_v1 = vrot.slane %v615_v56, 10  ;;  %v665_v3 = vsel %vm664_vm1, %v612_v53, %v644_v60  ;;  %v2040_v57 = vld [vmem:[%s2601_s4 + $0x200] sm:$0xff]  }
 0x106   :  { %v668_v2 = vsel %vm664_vm1, %v619_v59, %v615_v56  ;;  %v666_v5 = vsel %vm664_vm1, %v613_v38, %v645_v63  ;;  %v626_v9 = vrot.slane %v612_v53, 3  ;;  %v677_v11 = vpack.c.bf16 %v667_v50, %v667_v50  ;;  %v2041_v59 = vld [vmem:[%s2601_s4 + $0x248] sm:$0xff]   ;;  %v2044_v63 = vld [vmem:[%s2601_s4 + $0x210] sm:$0xff]   ;;  %v2045_v50 = vld [vmem:[%s2601_s4 + $0x258] sm:$0xff]  }
 0x107   :  { %v678_v6 = vpack.c.bf16 %v668_v2, %v668_v2  ;;  %v670_v8 = vsel %vm664_vm1, %v623_v61, %v1696_v0  ;;  %v676_v10 = vpack.c.bf16 %v666_v5, %v666_v5  ;;  %v672_v13 = vsel %vm664_vm1, %v627_v62, %v1698_v1  ;;  %v2042_v61 = vld [vmem:[%s2601_s4 + $0x208] sm:$0xff]   ;;  %v2043_v62 = vld [vmem:[%s2601_s4 + $0x250] sm:$0xff]   ;;  %v2046_v0 = vld [vmem:[%s2601_s4 + $0x218] sm:$0xff]  }
 0x108   :  { %v2380_v14 = vsel %vm664_vm1, %v622_v58, %v1695_v4  ;;  %v675_v15 = vpack.c.bf16 %v665_v3, %v665_v3  ;;  %v1697_v17 = vrot.slane %v614_v55, 10  ;;  %v631_v18 = vrot.slane %v613_v38, 4  ;;  %v2039_v38 = vld [vmem:[%s2601_s4 + $0x240] sm:$0xff]   ;;  %v2049_v3 = vld [vmem:[%s2601_s4 + $0x268] sm:$0xff]   ;;  %v2051_v5 = vld [vmem:[%s2601_s4 + $0x270] sm:$0xff]  }
 0x109   :  { %1404 = vmatprep.mubr.bf16.mxu1 %v678_v6  ;;  %1364 = vmatprep.mubr.bf16.mxu0 %v676_v10  ;;  %v680_v19 = vpack.c.bf16 %v670_v8, %v670_v8  ;;  %v1700_v21 = vrot.slane %v615_v56, 11  ;;  %v630_v22 = vrot.slane %v612_v53, 4  ;;  %v1699_v23 = vrot.slane %v614_v55, 11  ;;  %v2035_v53 = vld [vmem:[%s2601_s4 + $0x178] sm:$0xff]   ;;  %v2047_v1 = vld [vmem:[%s2601_s4 + $0x260] sm:$0xff]   ;;  %v2050_v4 = vld [vmem:[%s2601_s4 + $0x228] sm:$0xff]  }
 0x10a   :  { %1405 = vmatmul.mubr.bf16.vlgmr.msra.gmra.mrb[16].mxu1 %v677_v11  ;;  %1365 = vmatmul.mubr.bf16.vlgmr.msra.gmra.mrb[16].mxu0 %v675_v15  ;;  %v682_v24 = vpack.c.bf16 %v672_v13, %v672_v13  ;;  %v2392_v26 = vsel %vm664_vm1, %v626_v9, %v1697_v17  ;;  %v2037_v55 = vld [vmem:[%s2601_s4 + $0x138] sm:$0xff]   ;;  %v679_v58 = vpack.c.bf16 %v2380_v14, %v2380_v14  ;;  %v2048_v2 = vld [vmem:[%s2601_s4 + $0x220] sm:$0xff]   ;;  %v2052_v6 = vld [vmem:[%s2601_s4 + $0x230] sm:$0xff]   ;;  %v2084_v13 = vmov 0.0|0.0  }
 0x10b   :  { %1850 = vmatpush3.bf16.msra.mxu1 %v2010_v7  ;;  %1828 = vmatpush3.bf16.msra.mxu0 %v2009_v12  ;;  %v2401_v29 = vsel %vm664_vm1, %v631_v18, %v1700_v21  ;;  %v2404_v30 = vsel %vm664_vm1, %v630_v22, %v1699_v23  ;;  %v681_v56 = vpack.c.bf16 %v2392_v26, %v2392_v26  ;;  %v2053_v7 = vld [vmem:[%s2601_s4 + $0x278] sm:$0xff]   ;;  %v1533_v10 = vld [vmem:[%s2603_s6] sm:$0xff]  ;;  %v1534_v11 = vld [vmem:[%s2603_s6 + $0x8] sm:$0xff] }
 0x10c   :  { %1444 = vmatprep.mubr.bf16.mxu0 %v680_v19  ;;  %1484 = vmatprep.mubr.bf16.mxu1 %v682_v24  ;;  %v684_v60 = vpack.c.bf16 %v2401_v29, %v2401_v29  ;;  %v2054_v8 = vld [vmem:[%s2601_s4 + $0x238] sm:$0xff]   ;;  %v683_v9 = vpack.c.bf16 %v2404_v30, %v2404_v30  ;;  %v1535_v12 = vld [vmem:[%s2603_s6 + $0x10] sm:$0xff]  ;;  %v1946_v14 = vpack.c.bf16 %v1534_v11, %v1533_v10  ;;  %v1537_v17 = vld [vmem:[%s2603_s6 + $0x20] sm:$0xff] }
 0x10d   :  { %1829 = vmatprep.subr.bf16.mxu0 %v2011_v16  ;;  %1851 = vmatprep.subr.bf16.mxu1 %v2012_v20  ;;  %v1536_v15 = vld [vmem:[%s2603_s6 + $0x18] sm:$0xff]  ;;  %v1538_v18 = vld [vmem:[%s2603_s6 + $0x28] sm:$0xff]  ;;  %v1539_v20 = vld [vmem:[%s2603_s6 + $0x30] sm:$0xff] }
 0x10e   :  { %v1949_v16 = vpack.c.bf16 %v1536_v15, %v1535_v12  ;;  %v1952_v19 = vpack.c.bf16 %v1538_v18, %v1537_v17  ;;  %v1540_v21 = vld [vmem:[%s2603_s6 + $0x38] sm:$0xff]  ;;  %v1541_v23 = vld [vmem:[%s2603_s6 + $0x40] sm:$0xff]  ;;  %v1542_v24 = vld [vmem:[%s2603_s6 + $0x48] sm:$0xff] }
 0x10f   :  { %1852 = vmatpush3.bf16.msra.mxu1 %v2014_v25  ;;  %1830 = vmatpush3.bf16.msra.mxu0 %v2013_v27  ;;  %v1955_v22 = vpack.c.bf16 %v1540_v21, %v1539_v20  ;;  %v1958_v25 = vpack.c.bf16 %v1542_v24, %v1541_v23  ;;  %v1543_v26 = vld [vmem:[%s2603_s6 + $0x50] sm:$0xff]  ;;  %v1544_v27 = vld [vmem:[%s2603_s6 + $0x58] sm:$0xff]  ;;  %v1545_v29 = vld [vmem:[%s2603_s6 + $0x60] sm:$0xff] }
 0x110   :  { %1853 = vmatprep.subr.bf16.mxu1 %v2016_v28  ;;  %1831 = vmatprep.subr.bf16.mxu0 %v2015_v31  ;;  %v1961_v28 = vpack.c.bf16 %v1544_v27, %v1543_v26  ;;  %v1546_v30 = vld [vmem:[%s2603_s6 + $0x68] sm:$0xff] }
 0x111   :  { %v1964_v31 = vpack.c.bf16 %v1546_v30, %v1545_v29 }
 0x113   :  { %1854 = vmatpush3.bf16.msra.mxu1 %v2018_v32  ;;  %1832 = vmatpush3.bf16.msra.mxu0 %v2017_v33  ;;  %v1547_v32 = vld [vmem:[%s2603_s6 + $0x70] sm:$0xff]  ;;  %v1548_v33 = vld [vmem:[%s2603_s6 + $0x78] sm:$0xff] }
 0x114   :  { %1855 = vmatprep.subr.bf16.mxu1 %v2020_v34  ;;  %1833 = vmatprep.subr.bf16.mxu0 %v2019_v35  ;;  %v1967_v34 = vpack.c.bf16 %v1548_v33, %v1547_v32  ;;  %v2086_v35 = vmov 0.0  }
 0x117   :  { %1856 = vmatpush3.bf16.msra.mxu1 %v2022_v36  ;;  %1834 = vmatpush3.bf16.msra.mxu0 %v2021_v37 }
 0x118   :  { %1857 = vmatprep.subr.bf16.mxu1 %v2024_v39  ;;  %1835 = vmatprep.subr.bf16.mxu0 %v2023_v40  ;;  %v1701_v40 = vld [vmem:[%s2602_s5] ss:$0 sm:$0xff] }
 0x11b   :  { %1858 = vmatpush3.bf16.msra.mxu1 %v2026_v41  ;;  %1836 = vmatpush3.bf16.msra.mxu0 %v2025_v42 }
 0x11c   :  { %1859 = vmatprep.subr.bf16.mxu1 %v2028_v43  ;;  %1837 = vmatprep.subr.bf16.mxu0 %v2027_v44 }
 0x11f   :  { %1860 = vmatpush3.bf16.msra.mxu1 %v2030_v45  ;;  %1838 = vmatpush3.bf16.msra.mxu0 %v2029_v46 }
 0x120   :  { %1861 = vmatprep.subr.bf16.mxu1 %v2032_v47  ;;  %1839 = vmatprep.subr.bf16.mxu0 %v2031_v48 }
 0x123   :  { %1862 = vmatpush3.bf16.msra.mxu1 %v2034_v49  ;;  %1840 = vmatpush3.bf16.msra.mxu0 %v2033_v51 }
 0x124   :  { %1863 = vmatprep.subr.bf16.mxu1 %v2036_v52  ;;  %1841 = vmatprep.subr.bf16.mxu0 %v2035_v53 }
 0x127   :  { %1864 = vmatpush3.bf16.msra.mxu1 %v2038_v54  ;;  %1842 = vmatpush3.bf16.msra.mxu0 %v2037_v55 }
 0x128   :  { %1871 = vmatprep.subr.bf16.mxu0 %v2039_v38  ;;  %1945 = vmatprep.subr.bf16.mxu1 %v2084_v13 }
 0x12a   :  { %1485 = vmatmul.mubr.bf16.vlgmr.msra.gmra.mrb[20].mxu1 %v681_v56  ;;  %1445 = vmatmul.mubr.bf16.vlgmr.msra.gmra.mrb[20].mxu0 %v679_v58 }
 0x12b   :  { %1872 = vmatpush3.bf16.msra.mxu0 %v2040_v57  ;;  %1524 = vmatprep.mubr.bf16.mxu0 %v684_v60 }
 0x12c   :  { %1873 = vmatprep.subr.bf16.mxu0 %v2041_v59  ;;  %1947 = vmatpush3.bf16.msra.mxu1 %v1946_v14 }
 0x12d   :  { %1948 = vmatprep.subr.bf16.mxu1 %v2084_v13  ;;  %1942 = vmatprep.mubr.msk.f32.mxu1 %vm2085_vm2, %v2086_v35 }
 0x12f   :  { %1874 = vmatpush3.bf16.msra.mxu0 %v2042_v61 }
 0x130   :  { %1875 = vmatprep.subr.bf16.mxu0 %v2043_v62  ;;  %1950 = vmatpush3.bf16.msra.mxu1 %v1949_v16 }
 0x131   :  { %1951 = vmatprep.subr.bf16.mxu1 %v2084_v13 }
 0x133   :  { %1876 = vmatpush3.bf16.msra.mxu0 %v2044_v63 }
 0x134   :  { %1877 = vmatprep.subr.bf16.mxu0 %v2045_v50  ;;  %1953 = vmatpush3.bf16.msra.mxu1 %v1952_v19 }
 0x135   :  { %1954 = vmatprep.subr.bf16.mxu1 %v2084_v13 }
 0x137   :  { %1878 = vmatpush3.bf16.msra.mxu0 %v2046_v0 }
 0x138   :  { %1879 = vmatprep.subr.bf16.mxu0 %v2047_v1  ;;  %1956 = vmatpush3.bf16.msra.mxu1 %v1955_v22 }
 0x139   :  { %1957 = vmatprep.subr.bf16.mxu1 %v2084_v13 }
 0x13b   :  { %1880 = vmatpush3.bf16.msra.mxu0 %v2048_v2 }
 0x13c   :  { %1881 = vmatprep.subr.bf16.mxu0 %v2049_v3  ;;  %1959 = vmatpush3.bf16.msra.mxu1 %v1958_v25 }
 0x13d   :  { %1960 = vmatprep.subr.bf16.mxu1 %v2084_v13 }
 0x13f   :  { %1882 = vmatpush3.bf16.msra.mxu0 %v2050_v4  ;;  %v1782_v4 = vld [vmem:[%s2604_s7] ss:$0 sm:$0xff]  ;;  %s2059_s7 = scalar_lea.vmem %s1646_s14, 32 }
 0x140   :  { %1883 = vmatprep.subr.bf16.mxu0 %v2051_v5  ;;  %1962 = vmatpush3.bf16.msra.mxu1 %v1961_v28  ;;  %p2060_p0 = scmp.ne.s32.totalorder %s1646_s14, %s2059_s7  ;;  %p2065_p2 = scmp.lt.s32.totalorder %s2059_s7, %s2059_s7 }
 0x141   :  { %1963 = vmatprep.subr.bf16.mxu1 %v2084_v13 }
 0x142   :  { %p2066_p3 = por %p2065_p2, %p2064_p1 }
 0x143   :  { %1884 = vmatpush3.bf16.msra.mxu0 %v2052_v6 }
 0x144   :  { %1885 = vmatprep.subr.bf16.mxu0 %v2053_v7  ;;  %1965 = vmatpush3.bf16.msra.mxu1 %v1964_v31  ;;  %p2067_p4 = pnand %p2066_p3, %p2060_p0 }
 0x145   :  { %1966 = vmatprep.subr.bf16.mxu1 %v2084_v13 }
 0x147   :  { %1886 = vmatpush3.bf16.msra.mxu0 %v2054_v8 }
 0x148   :  { %1968 = vmatpush3.bf16.msra.mxu1 %v1967_v34 }
 0x14a   :  { %1525 = vmatmul.mubr.bf16.vlgmr.msra.gmra.mrb[24].mxu0 %v683_v9 }
 0x1dd   :  { %v1821_v36 = vpop.f32.mrb[16].mxu1  ;;  %v1799_v37 = vpop.f32.mrb[16].mxu0 }
 0x1de   :  { %v1822_v39 = vpop.f32.mrb[17].mxu1  ;;  %v1800_v41 = vpop.f32.mrb[17].mxu0 }
 0x1df   :  { %v1823_v42 = vadd.f32 %v1822_v39, %v1821_v36  ;;  %v1824_v43 = vpop.f32.mrb[18].mxu1  ;;  %v1801_v44 = vadd.f32 %v1800_v41, %v1799_v37  ;;  %v1802_v45 = vpop.f32.mrb[18].mxu0 }
 0x1e0   :  { %v1825_v46 = vpop.f32.mrb[19].mxu1  ;;  %v1803_v47 = vpop.f32.mrb[19].mxu0 }
 0x1e1   :  { %v1367_v48 = vadd.f32 %v1801_v44, %v1701_v40 }
 0x1e3   :  { %v1407_v49 = vadd.f32 %v1823_v42, %v1367_v48 }
 0x1fd   :  { %v1865_v51 = vpop.f32.mrb[20].mxu1  ;;  %v1843_v52 = vpop.f32.mrb[20].mxu0 }
 0x1fe   :  { %v1866_v53 = vpop.f32.mrb[21].mxu1  ;;  %v1844_v54 = vpop.f32.mrb[21].mxu0 }
 0x1ff   :  { %v1867_v55 = vadd.f32 %v1866_v53, %v1865_v51  ;;  %v1868_v38 = vpop.f32.mrb[22].mxu1  ;;  %v1845_v56 = vadd.f32 %v1844_v54, %v1843_v52  ;;  %v1846_v57 = vpop.f32.mrb[22].mxu0 }
 0x200   :  { %v1869_v58 = vpop.f32.mrb[23].mxu1  ;;  %v1847_v59 = vpop.f32.mrb[23].mxu0 }
 0x201   :  { %v1447_v60 = vadd.f32 %v1845_v56, %v1407_v49 }
 0x203   :  { %v1487_v61 = vadd.f32 %v1867_v55, %v1447_v60 }
 0x21d   :  { %v1887_v62 = vpop.f32.mrb[24].mxu0 }
 0x21e   :  { %v1888_v63 = vpop.f32.mrb[25].mxu0 }
 0x21f   :  { %v1889_v50 = vadd.f32 %v1888_v63, %v1887_v62  ;;  %v1890_v0 = vpop.f32.mrb[26].mxu0 }
 0x220   :  { %v1891_v1 = vpop.f32.mrb[27].mxu0 }
 0x221   :  { %v1527_v2 = vadd.f32 %v1889_v50, %v1487_v61 }
 0x223   :  { %v1532_v3 = vmax.f32 %v1527_v2, 0.0 }
 0x225   :  { %1943 = vmatmul.mubr.f32.vlgmr.msra.gmra.mrb[24].mxu1 %v1532_v3 }
 0x2f8   :  { %v1622_v5 = vpop.f32.mrb[24].mxu1 }
 0x2f9   :  { %v1623_v6 = vadd.f32 %v1782_v4, %v1622_v5  ;;  %v1944_v7 = vpop.f32.mrb[25].mxu1 }
 0x2fb   :  { %v1627_v8 = vsel %vm1626_vm3, %v1623_v6, -inf }
 0x2fc   :  { %1628 = vmax.xlane.f32.xlu1 %v1627_v8 }
 0x389   :  { %v1629_v9 = vpop.xlane.xlu1 %1628 }
 0x38a   :  { %v1630_v10 = vsub.f32 %v1623_v6, %v1629_v9 }
 0x38c   :  { %v1631_v11 = vmul.f32 1.442695, %v1630_v10 }
 0x38e   :  { %2055 = vpow2.f32 %v1631_v11 }
 0x398   :  { %v2056_v12 = vpop.eup %2055 }
 0x399   :  { %v1633_v13 = vsel %vm1626_vm3, %v2056_v12, 0.0 }
 0x39a   :  { %1634 = vadd.xlane.f32.xlu1 %v1633_v13 }
 0x427   :  { %v1635_v14 = vpop.xlane.xlu1 %1634 }
 0x428   :  { %2057 = vrcp.f32 %v1635_v14 }
 0x432   :  { %v2058_v15 = vpop.eup %2057 }
 0x433   :  { %v1637_v16 = vmul.f32 %v2058_v15, %v2056_v12 }
 0x435   :  { %1638 = vst [vmem:[#allocation2] sm:$0x3] %v1637_v16 }
 0x436   :  { %2070 = shalt.err (!%p2067_p4)
}
 0x437   :  { %s2071_s17 = scalar_lea.hbm %s2605_s8, 32 }
 0x438   :  { %p2072_p5 = scmp.ne.s32.totalorder %s2605_s8, %s2071_s17  ;;  %p2075_p6 = scmp.lt.u32.totalorder %s2071_s17, %s2605_s8 }
 0x43a   :  { %p2077_p7 = pnand %p2075_p6, %p2072_p5 }
 0x43c   :  { %2080 = shalt.err (!%p2077_p7)
}
 0x43d   :  { %1648 = dma.vmem_to_hbm [thread:$0]  %s1646_s14, 32, %s2605_s8, [#allocation3]  }
 0x43e   :  { %2081 = dma.done.wait [#allocation3], 32  }
 0x43f   :  { %2082 = vsyncadd [#allocation3], 4294967264 }
 0x440   :  { %1652 = vsyncpa [#allocation3], 1 }

</bundles_post_ra>
